<compile_context>
chip_gen: v6e
topology: v6e:2x2x1
jax: 0.10.0
libtpu: 0.0.40
codegen_flags: <defaults>
</compile_context>

<pallas_src>
import jax
import jax.numpy as jnp
from jax.experimental import pallas as pl
from jax.experimental.pallas import tpu as pltpu

LAYER_SIZES = [2, 2]  # matches the PyTorch module: nn.Linear(2, 2, bias=True)
IN_F, OUT_F = LAYER_SIZES


def _linear_kernel(x_ref, w_ref, b_ref, o_ref):
    # x_ref: (TB, IN_F)   VMEM f32
    # w_ref: (OUT_F, IN_F) SMEM f32 (PyTorch (out, in) layout, read as scalars)
    # b_ref: (OUT_F,)      SMEM f32
    # o_ref: (TB, OUT_F)  VMEM f32
    x = x_ref[...]  # single vreg-sized tile
    # y[:, o] = sum_k x[:, k] * W[o, k] + b[o]  -- pure VPU, no MXU.
    for o in range(OUT_F):
        acc = x[:, 0:1] * w_ref[o, 0]
        for k in range(1, IN_F):
            acc = acc + x[:, k:k + 1] * w_ref[o, k]
        o_ref[:, o:o + 1] = (acc + b_ref[o]).astype(o_ref.dtype)


def net_forward(x, weight, bias, *, max_batch_tile=512):
    """Equivalent of Net.forward: y = x @ weight.T + bias.

    x:      (B, in_features)           float32
    weight: (out_features, in_features) float32  (PyTorch convention, unchanged)
    bias:   (out_features,)             float32
    """
    B, in_f = x.shape
    out_f, in_f_w = weight.shape
    assert in_f == in_f_w == IN_F and out_f == OUT_F

    # Batch tile: multiple of 8 sublanes; amortizes per-step overhead as B grows.
    if B <= max_batch_tile:
        tb = ((B + 7) // 8) * 8
    else:
        tb = max_batch_tile
    Bp = ((B + tb - 1) // tb) * tb
    xp = jnp.pad(x, ((0, Bp - B), (0, 0))) if Bp != B else x

    grid = (Bp // tb,)
    flops = 2 * Bp * in_f * out_f
    bytes_accessed = 4 * (Bp * in_f + out_f * in_f + out_f + Bp * out_f)

    out = pl.pallas_call(
        _linear_kernel,
        out_shape=jax.ShapeDtypeStruct((Bp, out_f), x.dtype),
        grid=grid,
        in_specs=[
            pl.BlockSpec((tb, in_f), lambda i: (i, 0)),           # x tiles
            pl.BlockSpec(memory_space=pltpu.MemorySpace.SMEM),    # weight (resident)
            pl.BlockSpec(memory_space=pltpu.MemorySpace.SMEM),    # bias (resident)
        ],
        out_specs=pl.BlockSpec((tb, out_f), lambda i: (i, 0)),
        compiler_params=pltpu.CompilerParams(
            dimension_semantics=("parallel",),  # batch axis -> shard over TCs (v7x)
        ),
        cost_estimate=pl.CostEstimate(
            flops=flops, transcendentals=0, bytes_accessed=bytes_accessed),
    )(xp, weight, bias)

    return out[:B] if Bp != B else out


if __name__ == "__main__":
    key = jax.random.PRNGKey(0)
    k_x, k_w, k_b = jax.random.split(key, 3)

    in_f, out_f = LAYER_SIZES
    batch = 8

    # PyTorch-style nn.Linear init: uniform in [-1/sqrt(in_f), 1/sqrt(in_f)].
    bound = 1.0 / jnp.sqrt(jnp.float32(in_f))
    weight = jax.random.uniform(k_w, (out_f, in_f), jnp.float32, -bound, bound)
    bias = jax.random.uniform(k_b, (out_f,), jnp.float32, -bound, bound)

    x = jax.random.normal(k_x, (batch, in_f), jnp.float32)

    out = net_forward(x, weight, bias)
    out = jax.block_until_ready(out)

    # Correctness check against plain-JAX reference of the PyTorch forward.
    ref = x @ weight.T + bias
    assert out.shape == (batch, out_f)
    assert jnp.allclose(out, ref, atol=1e-5, rtol=1e-5)

    print("KERNEL_OK")
</pallas_src>

<mosaic_0001>
module attributes {stable_mosaic.version = 11 : i64} {
  func.func @_linear_kernel(%arg0: i32, %arg1: memref<8x2xf32, #tpu.memory_space<vmem>>, %arg2: memref<2x2xf32, #tpu.memory_space<smem>>, %arg3: memref<2xf32, #tpu.memory_space<smem>>, %arg4: memref<8x2xf32, #tpu.memory_space<vmem>>) attributes {dimension_semantics = [#tpu.dimension_semantics<parallel>], iteration_bounds = array<i64: 1>, scalar_prefetch = 0 : i64, scratch_operands = 0 : i64, tpu.core_type = #tpu.core_type<tc>, window_params = [{transform_indices = @transform_0, window_bounds = array<i64: 8, 2>}, {transform_indices = @transform_1, window_bounds = array<i64: 2, 2>}, {transform_indices = @transform_2, window_bounds = array<i64: 2>}, {transform_indices = @transform_3, window_bounds = array<i64: 8, 2>}]} {
    %c0 = arith.constant 0 : index
    %c0_0 = arith.constant 0 : index
    %0 = vector.load %arg1[%c0, %c0_0] : memref<8x2xf32, #tpu.memory_space<vmem>>, vector<8x2xf32>
    %1 = vector.extract_strided_slice %0 {offsets = [0, 0], sizes = [8, 1], strides = [1, 1]} : vector<8x2xf32> to vector<8x1xf32>
    %c0_1 = arith.constant 0 : index
    %c0_2 = arith.constant 0 : index
    %2 = memref.load %arg2[%c0_1, %c0_2] : memref<2x2xf32, #tpu.memory_space<smem>>
    %3 = vector.broadcast %2 : f32 to vector<8x1xf32>
    %4 = arith.mulf %1, %3 : vector<8x1xf32>
    %5 = vector.extract_strided_slice %0 {offsets = [0, 1], sizes = [8, 1], strides = [1, 1]} : vector<8x2xf32> to vector<8x1xf32>
    %c0_3 = arith.constant 0 : index
    %c1 = arith.constant 1 : index
    %6 = memref.load %arg2[%c0_3, %c1] : memref<2x2xf32, #tpu.memory_space<smem>>
    %7 = vector.broadcast %6 : f32 to vector<8x1xf32>
    %8 = arith.mulf %5, %7 : vector<8x1xf32>
    %9 = arith.addf %4, %8 : vector<8x1xf32>
    %c0_4 = arith.constant 0 : index
    %10 = memref.load %arg3[%c0_4] : memref<2xf32, #tpu.memory_space<smem>>
    %11 = vector.broadcast %10 : f32 to vector<8x1xf32>
    %12 = arith.addf %9, %11 : vector<8x1xf32>
    %c0_5 = arith.constant 0 : index
    %c0_6 = arith.constant 0 : index
    %13 = vector.load %arg4[%c0_5, %c0_6] : memref<8x2xf32, #tpu.memory_space<vmem>>, vector<8x1xf32>
    tpu.vector_store %arg4[%c0_5, %c0_6], %12 {strides = array<i32>} : memref<8x2xf32, #tpu.memory_space<vmem>>, vector<8x1xf32>,
    %14 = vector.extract_strided_slice %0 {offsets = [0, 0], sizes = [8, 1], strides = [1, 1]} : vector<8x2xf32> to vector<8x1xf32>
    %c1_7 = arith.constant 1 : index
    %c0_8 = arith.constant 0 : index
    %15 = memref.load %arg2[%c1_7, %c0_8] : memref<2x2xf32, #tpu.memory_space<smem>>
    %16 = vector.broadcast %15 : f32 to vector<8x1xf32>
    %17 = arith.mulf %14, %16 : vector<8x1xf32>
    %18 = vector.extract_strided_slice %0 {offsets = [0, 1], sizes = [8, 1], strides = [1, 1]} : vector<8x2xf32> to vector<8x1xf32>
    %c1_9 = arith.constant 1 : index
    %c1_10 = arith.constant 1 : index
    %19 = memref.load %arg2[%c1_9, %c1_10] : memref<2x2xf32, #tpu.memory_space<smem>>
    %20 = vector.broadcast %19 : f32 to vector<8x1xf32>
    %21 = arith.mulf %18, %20 : vector<8x1xf32>
    %22 = arith.addf %17, %21 : vector<8x1xf32>
    %c1_11 = arith.constant 1 : index
    %23 = memref.load %arg3[%c1_11] : memref<2xf32, #tpu.memory_space<smem>>
    %24 = vector.broadcast %23 : f32 to vector<8x1xf32>
    %25 = arith.addf %22, %24 : vector<8x1xf32>
    %c0_12 = arith.constant 0 : index
    %c1_13 = arith.constant 1 : index
    %26 = vector.load %arg4[%c0_12, %c1_13] : memref<8x2xf32, #tpu.memory_space<vmem>>, vector<8x1xf32>
    tpu.vector_store %arg4[%c0_12, %c1_13], %25 {strides = array<i32>} : memref<8x2xf32, #tpu.memory_space<vmem>>, vector<8x1xf32>,
    return
  }
  func.func @transform_0(%arg0: i32) -> (i32, i32) {
    %c0_i32 = arith.constant 0 : i32
    %c0_i32_0 = arith.constant 0 : i32
    return %arg0, %c0_i32 : i32, i32
  }
  func.func @transform_1(%arg0: i32) -> (i32, i32) {
    %c0_i32 = arith.constant 0 : i32
    %c0_i32_0 = arith.constant 0 : i32
    %c0_i32_1 = arith.constant 0 : i32
    return %c0_i32, %c0_i32_0 : i32, i32
  }
  func.func @transform_2(%arg0: i32) -> i32 {
    %c0_i32 = arith.constant 0 : i32
    %c0_i32_0 = arith.constant 0 : i32
    return %c0_i32 : i32
  }
  func.func @transform_3(%arg0: i32) -> (i32, i32) {
    %c0_i32 = arith.constant 0 : i32
    %c0_i32_0 = arith.constant 0 : i32
    return %arg0, %c0_i32 : i32, i32
  }
}

</mosaic_0001>

<bundles_post_ra>
// kernel: tpu_custom_call.1
= control target key start
LH: loop header
LB: loop body
LE: loop exit
PB: predicated region body
PF: predicated region fallthrough
CT: control target
= control target key end

     0   :  { %8 = vsyncpa [#allocation3], 0  ;;  %s157_s0 = inlined_call_operand.vmem [shape: f32[8,2], index: 0, kind: input, shape index: {}]   ;;  %s158_s1 = inlined_call_operand.vmem [shape: f32[2,2], index: 1, kind: input, shape index: {}]   ;;  %s159_s2 = inlined_call_operand.vmem [shape: f32[2], index: 2, kind: input, shape index: {}]   ;;  %s160_s3 = inlined_call_operand.vmem [shape: f32[8,2], index: 3, kind: output, shape index: {}]  }
   0x1   :  { %s18_s14 = sshll.u32 %s158_s1, 4  ;;  %s19_s14 = int_to_ptr.vmem [resolvable:$true] %s18_s14 }
   0x2   :  { %9 = vsyncpa [#allocation5], 0  ;;  %s28_s17 = sshll.u32 %s159_s2, 4  ;;  %s90_s18 = scalar_lea.vmem %s19_s14, 32  ;;  %s29_s17 = int_to_ptr.vmem [resolvable:$true] %s28_s17 }
   0x3   :  { %p91_p0 = scmp.ne.s32.totalorder %s19_s14, %s90_s18  ;;  %p95_p1 = scmp.lt.s32.totalorder %s19_s14, %s19_s14 }
   0x4   :  { %p96_p2 = scmp.lt.s32.totalorder %s90_s18, %s90_s18 }
   0x6   :  { %p97_p3 = por %p96_p2, %p95_p1 }
   0x8   :  { %p98_p4 = pnand %p97_p3, %p91_p0 }
   0xa   :  { %101 = shalt.err (!%p98_p4)
}
   0xb   :  { %s118_s19 = smov [#allocation2]   ;;  %s102_s20 = scalar_lea.vmem %s29_s17, 16 }
   0xc   :  { %21 = dma.vmem_to_smem %s19_s14, 32, %s118_s19, [#allocation3]  }
   0xd   :  { %p103_p5 = scmp.ne.s32.totalorder %s29_s17, %s102_s20  ;;  %p107_p6 = scmp.lt.s32.totalorder %s29_s17, %s29_s17 }
   0xe   :  { %p108_p7 = scmp.lt.s32.totalorder %s102_s20, %s102_s20 }
  0x10   :  { %p109_p8 = por %p108_p7, %p107_p6 }
  0x12   :  { %p110_p9 = pnand %p109_p8, %p103_p5 }
  0x14   :  { %113 = shalt.err (!%p110_p9)
}
  0x15   :  { %s119_s1 = smov [#allocation4]  }
  0x16   :  { %31 = dma.vmem_to_smem %s29_s17, 16, %s119_s1, [#allocation5]  }
  0x17   :  { %114 = dma.done.wait [#allocation3], 32  }
  0x18   :  { %115 = vsyncadd [#allocation3], 4294967264 }
  0x19   :  { %116 = dma.done.wait [#allocation5], 16  }
  0x1a   :  { %117 = vsyncadd [#allocation5], 4294967280 }
  0x1b   :  { %38 = sfence }
  0x1c   :  { %s84_s2 = sld [smem:[#allocation2 + $0x81]]  ;;  %v39_v0 = vld [vmem:[%s157_s0] sm:$0xff]  ;;  %s120_s24 = smov 127   ;;  %vm54_vm0 = vcmask 7168   ;;  %vm74_vm1 = vcmask 15368  }
  0x1d   :  { %s82_s21 = sld [smem:[#allocation2 + $0x1]]  ;;  %s121_s0 = smov 1  }
  0x1e   :  { %s83_s25 = sld [smem:[#allocation2 + $0x80]] }
  0x1f   :  { %s40_s26 = sld [smem:[#allocation2]] }
  0x20   :  { %s85_s27 = sld [smem:[#allocation4 + $0x1]] }
  0x21   :  { %s51_s28 = sld [smem:[#allocation4]] }
  0x22   :  { %v60_v1 = vstv %s84_s2 }
  0x23   :  { %v61_v2 = vmul.f32 %v60_v1, %v39_v0  ;;  %v44_v3 = vstv %s82_s21 }
  0x24   :  { %v45_v4 = vmul.f32 %v44_v3, %v39_v0  ;;  %v57_v5 = vstv %s83_s25 }
  0x25   :  { %63 = vrot.lane.b32.xlu0 %v61_v2, %s120_s24  ;;  %v58_v6 = vmul.f32 %v57_v5, %v39_v0  ;;  %v41_v7 = vstv %s40_s26 }
  0x26   :  { %v68_v9 = vstv %s85_s27  ;;  %v42_v11 = vmul.f32 %v41_v7, %v39_v0 }
  0x27   :  { %v52_v13 = vstv %s51_s28 }
  0x29   :  { %47 = vrot.lane.b32.xlu0 %v45_v4, %s120_s24 }
  0x97   :  { %v64_v8 = vpop.permute.xlu0 %63 }
  0x98   :  { %v66_v10 = vadd.f32 %v64_v8, %v58_v6 }
  0x9a   :  { %v69_v12 = vadd.f32 %v68_v9, %v66_v10 }
  0x9b   :  { %v48_v14 = vpop.permute.xlu0 %47 }
  0x9c   :  { %71 = vrot.lane.b32.xlu1 %v69_v12, %s121_s0  ;;  %v50_v15 = vadd.f32 %v48_v14, %v42_v11 }
  0x9e   :  { %v53_v16 = vadd.f32 %v52_v13, %v50_v15 }
  0xa0   :  { %55 = vst.msk [vmem:[%s160_s3] sm:$0xff] %vm54_vm0, %v53_v16 }
 0x10e   :  { %v72_v17 = vpop.permute.xlu1 %71 }
 0x10f   :  { %75 = vst.msk [vmem:[%s160_s3] sm:$0xff] %vm74_vm1, %v72_v17 }
 0x110   :  { %80 = vsyncpa [#allocation3], 1 }
 0x111   :  { %81 = vsyncpa [#allocation5], 1 }

</bundles_post_ra>
